<compile_context>
chip_gen: v7x
topology: tpu7x:2x2x1
jax: 0.10.0
libtpu: 0.0.40
codegen_flags: <defaults>
</compile_context>

<pallas_src>
import math

import jax
import jax.numpy as jnp
from jax.experimental import pallas as pl
from jax.experimental.pallas import tpu as pltpu


def _rope_kernel(coords_ref, freq_ref, cos_ref, sin_ref):
    # coords_ref: (TS, 3)   freq_ref: (4, dim_p)   outputs: (TS, dim_p)
    gf = coords_ref[:, 0:1]                   # (TS, 1) ref-sliced loads
    gh = coords_ref[:, 1:2]
    gw = coords_ref[:, 2:3]
    # Rows 0..2 already contain 2*freq (masked per axis); row 3 contains freq.
    phase = (gf * freq_ref[0:1, :] + gh * freq_ref[1:2, :]
             + gw * freq_ref[2:3, :] - freq_ref[3:4, :])
    # Padding lanes have freq == 0 -> phase == 0 -> cos = 1, sin = 0.
    cos_ref[...] = jnp.cos(phase).astype(cos_ref.dtype)
    sin_ref[...] = jnp.sin(phase).astype(sin_ref.dtype)


def _vmem_budget_bytes():
    """(tile budget, vmem_limit_bytes) chosen per TPU generation."""
    phys = None
    try:
        phys = pltpu.get_tpu_info().vmem_capacity_bytes
    except Exception:
        phys = None
    if phys is not None and phys >= 128 * 1024 * 1024:      # v5e / v6e
        return 56 * 1024 * 1024, 80 * 1024 * 1024
    # v7x (64 MiB physical, 32 MiB scoped default) or unknown: stay small.
    return 20 * 1024 * 1024, 30 * 1024 * 1024


def _pick_tile(seq_len, dim_padded, out_itemsize, budget):
    # Per TS row: 2 outputs x 2 pipeline buffers x dim_p x itemsize, plus the
    # lane-padded coords tile (2 buffers x 128 lanes x 4 B).
    per_row = 2 * 2 * dim_padded * out_itemsize + 2 * 128 * 4
    fixed = 2 * 8 * dim_padded * 4                           # freq-table buffers
    cap = max(8, (((budget - fixed) // per_row) // 8) * 8)
    cap = min(cap, 4096)
    if seq_len <= cap:
        return seq_len                                        # full-extent block OK
    ts = cap
    assert ts % 8 == 0 and ts > 0
    return ts


class LTXVideoRotaryPosEmbed:
    def __init__(self, dim, base_num_frames=20, base_height=2048, base_width=2048,
                 patch_size=1, patch_size_t=1, theta=10000.0,
                 out_dtype=jnp.float32):
        self.dim = dim
        self.base_num_frames = base_num_frames
        self.base_height = base_height
        self.base_width = base_width
        self.patch_size = patch_size
        self.patch_size_t = patch_size_t
        self.theta = theta
        self.out_dtype = out_dtype

        # ---- static table encoding output-lane -> (frequency, axis) ----
        self.dim_padded = ((dim + 127) // 128) * 128   # lane-dense output width
        n_freq = dim // 6
        pad = dim % 6
        d = jnp.arange(dim)
        half = jnp.maximum(d - pad, 0) // 2       # index after repeat_interleave(2)
        freq_idx = half // 3                      # which frequency
        axis_idx = half % 3                       # which coord (frame / h / w)
        valid = d >= pad                          # leading dim%6 pad lanes -> 0
        if n_freq > 0:
            base_freqs = (theta ** jnp.linspace(0.0, 1.0, n_freq, dtype=jnp.float32)
                          ) * (math.pi / 2.0)                        # (dim//6,)
            freq_lane = jnp.where(valid, base_freqs[freq_idx], 0.0
                                  ).astype(jnp.float32)
        else:                                     # dim < 6: everything is padding
            freq_lane = jnp.zeros((dim,), jnp.float32)
        # Rows 0..2: 2*freq masked per axis (folds the reference's "* 2").
        rows = [jnp.where(axis_idx == a, 2.0 * freq_lane, 0.0) for a in range(3)]
        rows.append(freq_lane)                    # row 3: per-lane frequency
        table = jnp.stack(rows, axis=0)           # (4, dim)
        self.freq_table = jnp.zeros((4, self.dim_padded), jnp.float32
                                    ).at[:, :dim].set(table)

    # ---- coordinate grid construction (pure JAX glue) ----
    def _prepare_video_coords(self, batch_size, num_frames, height, width,
                              rope_interpolation_scale):
        gf, gh, gw = jnp.meshgrid(
            jnp.arange(num_frames, dtype=jnp.float32),
            jnp.arange(height, dtype=jnp.float32),
            jnp.arange(width, dtype=jnp.float32),
            indexing="ij")
        if rope_interpolation_scale is not None:
            s0, s1, s2 = rope_interpolation_scale
            gf = gf * (s0 * self.patch_size_t / self.base_num_frames)
            gh = gh * (s1 * self.patch_size / self.base_height)
            gw = gw * (s2 * self.patch_size / self.base_width)
        coords = jnp.stack([gf, gh, gw], axis=-1).reshape(1, -1, 3)     # (1, S, 3)
        if batch_size > 1:
            coords = jnp.broadcast_to(coords, (batch_size,) + coords.shape[1:])
        return coords

    # ---- Pallas-backed cos/sin table computation ----
    def _rope_tables(self, coords):
        Bk, S, _ = coords.shape
        dim, dim_p = self.dim, self.dim_padded
        out_dtype = self.out_dtype
        out_bytes = jnp.dtype(out_dtype).itemsize

        budget, vmem_limit = _vmem_budget_bytes()
        TS = _pick_tile(S, dim_p, out_bytes, budget)
        n_s = pl.cdiv(S, TS)

        cost = pl.CostEstimate(
            flops=7 * Bk * S * dim_p,
            transcendentals=2 * Bk * S * dim_p,
            bytes_accessed=(Bk * S * 3 * 4 + 4 * dim_p * 4
                            + 2 * Bk * S * dim_p * out_bytes))

        cos_p, sin_p = pl.pallas_call(
            _rope_kernel,
            out_shape=(jax.ShapeDtypeStruct((Bk, S, dim_p), out_dtype),
                       jax.ShapeDtypeStruct((Bk, S, dim_p), out_dtype)),
            # Sequence axis first so the large parallel axis is the one
            # megacore shards on v7x (batch is often 1 on the default path).
            grid=(n_s, Bk),
            in_specs=[
                pl.BlockSpec((None, TS, 3), lambda s, b: (b, s, 0)),   # coords tile
                pl.BlockSpec((4, dim_p), lambda s, b: (0, 0)),         # const table
            ],
            out_specs=(
                pl.BlockSpec((None, TS, dim_p), lambda s, b: (b, s, 0)),
                pl.BlockSpec((None, TS, dim_p), lambda s, b: (b, s, 0)),
            ),
            compiler_params=pltpu.CompilerParams(
                dimension_semantics=("parallel", "parallel"),
                vmem_limit_bytes=vmem_limit),
            cost_estimate=cost,
        )(coords, self.freq_table)

        if dim_p != dim:
            # Only hit for non-128-multiple dims (tests/odd configs); production
            # dims (e.g. 2048) skip this extra HBM pass entirely.
            cos_p = cos_p[..., :dim]
            sin_p = sin_p[..., :dim]
        return cos_p, sin_p

    def __call__(self, hidden_states, num_frames=None, height=None, width=None,
                 rope_interpolation_scale=None, video_coords=None):
        batch_size = hidden_states.shape[0]
        if video_coords is None:
            # cos/sin identical across batch: compute once, broadcast after
            # (broadcast stays lazy when fused into the rotary-apply consumer).
            coords = self._prepare_video_coords(1, num_frames, height, width,
                                                rope_interpolation_scale)
            broadcast_to_batch = batch_size
        else:
            coords = jnp.stack([video_coords[:, 0] / self.base_num_frames,
                                video_coords[:, 1] / self.base_height,
                                video_coords[:, 2] / self.base_width], axis=-1)
            broadcast_to_batch = None
        coords = coords.astype(jnp.float32)

        cos, sin = self._rope_tables(coords)
        if broadcast_to_batch is not None and broadcast_to_batch != cos.shape[0]:
            cos = jnp.broadcast_to(cos, (broadcast_to_batch,) + cos.shape[1:])
            sin = jnp.broadcast_to(sin, (broadcast_to_batch,) + sin.shape[1:])
        return cos, sin


# ---- pure-JAX reference mirroring the PyTorch math (for verification) ----
def _reference(dim, theta, grid_bsc):
    n = dim // 6
    f = (theta ** jnp.linspace(0.0, 1.0, n, dtype=jnp.float32)) * (math.pi / 2.0)
    phase = f * (grid_bsc[..., None] * 2.0 - 1.0)                       # (B,S,3,n)
    phase = jnp.swapaxes(phase, -1, -2).reshape(grid_bsc.shape[0],
                                                grid_bsc.shape[1], -1)  # (B,S,3n)
    cos = jnp.repeat(jnp.cos(phase), 2, axis=-1)
    sin = jnp.repeat(jnp.sin(phase), 2, axis=-1)
    if dim % 6 != 0:
        pad = dim % 6
        cos = jnp.concatenate([jnp.ones_like(cos[:, :, :pad]), cos], axis=-1)
        sin = jnp.concatenate([jnp.zeros_like(sin[:, :, :pad]), sin], axis=-1)
    return cos, sin


if __name__ == "__main__":
    # Small, module-consistent shapes.
    batch = 2
    num_frames, height, width = 2, 4, 4            # S = 32
    dim = 32                                       # dim % 6 == 2 -> exercises padding
    hidden_dim = 64
    S = num_frames * height * width

    key = jax.random.PRNGKey(0)
    k0, k1, k2, k3 = jax.random.split(key, 4)
    hidden_states = jax.random.normal(k0, (batch, S, hidden_dim), dtype=jnp.float32)
    rope_interpolation_scale = (0.4, 32.0, 32.0)

    module = LTXVideoRotaryPosEmbed(dim=dim)

    # ---- path 1: coordinates derived from (num_frames, height, width) ----
    cos, sin = module(hidden_states, num_frames=num_frames, height=height,
                      width=width, rope_interpolation_scale=rope_interpolation_scale)
    cos, sin = jax.block_until_ready((cos, sin))

    grid_ref = module._prepare_video_coords(batch, num_frames, height, width,
                                            rope_interpolation_scale)
    cos_ref, sin_ref = _reference(dim, module.theta, grid_ref)
    assert cos.shape == (batch, S, dim) and sin.shape == (batch, S, dim)
    assert cos.dtype == jnp.float32 and sin.dtype == jnp.float32
    assert jnp.allclose(cos, cos_ref, atol=1e-2), float(jnp.abs(cos - cos_ref).max())
    assert jnp.allclose(sin, sin_ref, atol=1e-2), float(jnp.abs(sin - sin_ref).max())

    # ---- path 2: explicit per-batch video_coords (B, 3, S) ----
    video_coords = jnp.stack([
        jax.random.uniform(k1, (batch, S), minval=0.0, maxval=20.0),
        jax.random.uniform(k2, (batch, S), minval=0.0, maxval=512.0),
        jax.random.uniform(k3, (batch, S), minval=0.0, maxval=512.0)], axis=1)
    cos2, sin2 = module(hidden_states, video_coords=video_coords)
    cos2, sin2 = jax.block_until_ready((cos2, sin2))

    grid_ref2 = jnp.stack([video_coords[:, 0] / module.base_num_frames,
                           video_coords[:, 1] / module.base_height,
                           video_coords[:, 2] / module.base_width], axis=-1)
    cos_ref2, sin_ref2 = _reference(dim, module.theta, grid_ref2)
    assert cos2.shape == (batch, S, dim) and sin2.shape == (batch, S, dim)
    assert jnp.allclose(cos2, cos_ref2, atol=1e-2), float(jnp.abs(cos2 - cos_ref2).max())
    assert jnp.allclose(sin2, sin_ref2, atol=1e-2), float(jnp.abs(sin2 - sin_ref2).max())

    # ---- path 3: bf16 output mode (halves HBM-write bytes; math stays f32) ----
    module_bf16 = LTXVideoRotaryPosEmbed(dim=dim, out_dtype=jnp.bfloat16)
    cos3, sin3 = module_bf16(hidden_states, num_frames=num_frames, height=height,
                             width=width,
                             rope_interpolation_scale=rope_interpolation_scale)
    cos3, sin3 = jax.block_until_ready((cos3, sin3))
    assert cos3.dtype == jnp.bfloat16 and sin3.dtype == jnp.bfloat16
    assert jnp.allclose(cos3.astype(jnp.float32), cos_ref, atol=2e-2)
    assert jnp.allclose(sin3.astype(jnp.float32), sin_ref, atol=2e-2)

    print("KERNEL_OK")
</pallas_src>

<mosaic_0001>
module attributes {stable_mosaic.version = 11 : i64} {
  func.func @_rope_kernel(%arg0: i32, %arg1: i32, %arg2: memref<1x32x3xf32, #tpu.memory_space<vmem>>, %arg3: memref<4x128xf32, #tpu.memory_space<vmem>>, %arg4: memref<1x32x128xf32, #tpu.memory_space<vmem>>, %arg5: memref<1x32x128xf32, #tpu.memory_space<vmem>>) attributes {dimension_semantics = [#tpu.dimension_semantics<parallel>, #tpu.dimension_semantics<parallel>], iteration_bounds = array<i64: 1, 1>, scalar_prefetch = 0 : i64, scratch_operands = 0 : i64, tpu.core_type = #tpu.core_type<tc>, window_params = [{transform_indices = @transform_0, window_bounds = array<i64: 1, 32, 3>}, {pipeline_mode = #tpu.pipeline_mode<synchronous>, transform_indices = @transform_1, window_bounds = array<i64: 4, 128>}, {transform_indices = @transform_2, window_bounds = array<i64: 1, 32, 128>}, {transform_indices = @transform_3, window_bounds = array<i64: 1, 32, 128>}]} {
    %c0 = arith.constant 0 : index
    %c0_0 = arith.constant 0 : index
    %c0_1 = arith.constant 0 : index
    %0 = vector.load %arg2[%c0, %c0_0, %c0_1] : memref<1x32x3xf32, #tpu.memory_space<vmem>>, vector<1x32x1xf32>
    %1 = vector.shape_cast %0 : vector<1x32x1xf32> to vector<32x1xf32>
    %c0_2 = arith.constant 0 : index
    %c0_3 = arith.constant 0 : index
    %c1 = arith.constant 1 : index
    %2 = vector.load %arg2[%c0_2, %c0_3, %c1] : memref<1x32x3xf32, #tpu.memory_space<vmem>>, vector<1x32x1xf32>
    %3 = vector.shape_cast %2 : vector<1x32x1xf32> to vector<32x1xf32>
    %c0_4 = arith.constant 0 : index
    %c0_5 = arith.constant 0 : index
    %c2 = arith.constant 2 : index
    %4 = vector.load %arg2[%c0_4, %c0_5, %c2] : memref<1x32x3xf32, #tpu.memory_space<vmem>>, vector<1x32x1xf32>
    %5 = vector.shape_cast %4 : vector<1x32x1xf32> to vector<32x1xf32>
    %c0_6 = arith.constant 0 : index
    %c0_7 = arith.constant 0 : index
    %6 = vector.load %arg3[%c0_6, %c0_7] : memref<4x128xf32, #tpu.memory_space<vmem>>, vector<1x128xf32>
    %7 = vector.broadcast %1 : vector<32x1xf32> to vector<32x128xf32>
    %8 = vector.broadcast %6 : vector<1x128xf32> to vector<32x128xf32>
    %9 = arith.mulf %7, %8 : vector<32x128xf32>
    %c1_8 = arith.constant 1 : index
    %c0_9 = arith.constant 0 : index
    %10 = vector.load %arg3[%c1_8, %c0_9] : memref<4x128xf32, #tpu.memory_space<vmem>>, vector<1x128xf32>
    %11 = vector.broadcast %3 : vector<32x1xf32> to vector<32x128xf32>
    %12 = vector.broadcast %10 : vector<1x128xf32> to vector<32x128xf32>
    %13 = arith.mulf %11, %12 : vector<32x128xf32>
    %14 = arith.addf %9, %13 : vector<32x128xf32>
    %c2_10 = arith.constant 2 : index
    %c0_11 = arith.constant 0 : index
    %15 = vector.load %arg3[%c2_10, %c0_11] : memref<4x128xf32, #tpu.memory_space<vmem>>, vector<1x128xf32>
    %16 = vector.broadcast %5 : vector<32x1xf32> to vector<32x128xf32>
    %17 = vector.broadcast %15 : vector<1x128xf32> to vector<32x128xf32>
    %18 = arith.mulf %16, %17 : vector<32x128xf32>
    %19 = arith.addf %14, %18 : vector<32x128xf32>
    %c3 = arith.constant 3 : index
    %c0_12 = arith.constant 0 : index
    %20 = vector.load %arg3[%c3, %c0_12] : memref<4x128xf32, #tpu.memory_space<vmem>>, vector<1x128xf32>
    %21 = vector.broadcast %20 : vector<1x128xf32> to vector<32x128xf32>
    %22 = arith.subf %19, %21 : vector<32x128xf32>
    %23 = math.cos %22 : vector<32x128xf32>
    %c0_13 = arith.constant 0 : index
    %c0_14 = arith.constant 0 : index
    %c0_15 = arith.constant 0 : index
    %24 = vector.load %arg4[%c0_13, %c0_14, %c0_15] : memref<1x32x128xf32, #tpu.memory_space<vmem>>, vector<1x32x128xf32>
    %25 = vector.shape_cast %24 : vector<1x32x128xf32> to vector<32x128xf32>
    %26 = vector.shape_cast %23 : vector<32x128xf32> to vector<1x32x128xf32>
    tpu.vector_store %arg4[%c0_13, %c0_14, %c0_15], %26 {strides = array<i32>} : memref<1x32x128xf32, #tpu.memory_space<vmem>>, vector<1x32x128xf32>,
    %27 = math.sin %22 : vector<32x128xf32>
    %c0_16 = arith.constant 0 : index
    %c0_17 = arith.constant 0 : index
    %c0_18 = arith.constant 0 : index
    %28 = vector.load %arg5[%c0_16, %c0_17, %c0_18] : memref<1x32x128xf32, #tpu.memory_space<vmem>>, vector<1x32x128xf32>
    %29 = vector.shape_cast %28 : vector<1x32x128xf32> to vector<32x128xf32>
    %30 = vector.shape_cast %27 : vector<32x128xf32> to vector<1x32x128xf32>
    tpu.vector_store %arg5[%c0_16, %c0_17, %c0_18], %30 {strides = array<i32>} : memref<1x32x128xf32, #tpu.memory_space<vmem>>, vector<1x32x128xf32>,
    return
  }
  func.func @transform_0(%arg0: i32, %arg1: i32) -> (i32, i32, i32) {
    %c0_i32 = arith.constant 0 : i32
    %c0_i32_0 = arith.constant 0 : i32
    return %arg1, %arg0, %c0_i32 : i32, i32, i32
  }
  func.func @transform_1(%arg0: i32, %arg1: i32) -> (i32, i32) {
    %c0_i32 = arith.constant 0 : i32
    %c0_i32_0 = arith.constant 0 : i32
    %c0_i32_1 = arith.constant 0 : i32
    return %c0_i32, %c0_i32_0 : i32, i32
  }
  func.func @transform_2(%arg0: i32, %arg1: i32) -> (i32, i32, i32) {
    %c0_i32 = arith.constant 0 : i32
    %c0_i32_0 = arith.constant 0 : i32
    return %arg1, %arg0, %c0_i32 : i32, i32, i32
  }
  func.func @transform_3(%arg0: i32, %arg1: i32) -> (i32, i32, i32) {
    %c0_i32 = arith.constant 0 : i32
    %c0_i32_0 = arith.constant 0 : i32
    return %arg1, %arg0, %c0_i32 : i32, i32, i32
  }
}

</mosaic_0001>

<bundles_post_ra>
// kernel: tpu_custom_call.1
= control target key start
LH: loop header
LB: loop body
LE: loop exit
PB: predicated region body
PF: predicated region fallthrough
CT: control target
= control target key end

     0   :  { %9 = vsyncpa [#allocation3], 0  ;;  %v1118_v2 = vmov 0   ;;  %s1491_s0 = inlined_call_operand.vmem [shape: f32[1,32,3], index: 0, kind: input, shape index: {}]   ;;  %s1492_s1 = inlined_call_operand.vmem [shape: f32[4,128], index: 1, kind: input, shape index: {}]   ;;  %s1493_s2 = inlined_call_operand.hbm [shape: f32[1,32,128], index: 2, kind: output, shape index: {0}]   ;;  %s1494_s3 = inlined_call_operand.hbm [shape: f32[1,32,128], index: 3, kind: output, shape index: {1}]  }
   0x1   :  { %v17_v0 = vld [vmem:[%s1491_s0 + $0x10] sm:$0xff]  ;;  %v15_v1 = vld [vmem:[%s1491_s0] sm:$0xff]  ;;  %1049 = vset.pattern.permute.xlu1 %v1118_v2  ;;  %1048 = vset.pattern.permute.xlu0 %v1118_v2 }
   0x2   :  { %10 = vsyncpa [#allocation5], 0  ;;  %32 = vperm.xlu1 %1049, %v17_v0   ;;  %22 = vperm.xlu0 %1048, %v15_v1   ;;  %v18_v3 = vld [vmem:[%s1491_s0 + $0x18] sm:$0xff]  ;;  %v16_v4 = vld [vmem:[%s1491_s0 + $0x8] sm:$0xff]  ;;  %v1119_v5 = vmov 1   ;;  %v1120_v6 = vmov 2  }
   0x3   :  { %v984_v13 = vld [vmem:[%s1492_s1 + $0x1] ss:$0 sm:$0xff]  ;;  %v983_v16 = vld [vmem:[%s1492_s1] ss:$0 sm:$0xff]  ;;  %v985_v21 = vld [vmem:[%s1492_s1 + $0x2] ss:$0 sm:$0xff] }
   0x4   :  { %v986_v29 = vld [vmem:[%s1492_s1 + $0x3] ss:$0 sm:$0xff]  ;;  %s1127_s1 = smov [#allocation2]   ;;  %s1128_s28 = smov [#allocation4]  }
   0x5   :  { %s956_s27 = sshll.u32 %s1127_s1, 4  ;;  %s968_s29 = sshll.u32 %s1128_s28, 4  ;;  %s957_s27 = int_to_ptr.vmem [resolvable:$true] %s956_s27  ;;  %s1460_s29 = int_to_ptr.vmem [resolvable:$true] %s968_s29 }
   0x6   :  { %37 = vperm.xlu1 %1049, %v18_v3   ;;  %27 = vperm.xlu0 %1048, %v16_v4   ;;  %s1070_s30 = scalar_lea.vmem %s957_s27, 512  ;;  %p1075_p1 = scmp.lt.s32.totalorder %s957_s27, %s957_s27 }
   0x7   :  { %p1071_p0 = scmp.ne.s32.totalorder %s957_s27, %s1070_s30  ;;  %p1076_p2 = scmp.lt.s32.totalorder %s1070_s30, %s1070_s30 }
   0x9   :  { %p1077_p3 = por %p1076_p2, %p1075_p1 }
   0xa   :  { %1051 = vset.pattern.permute.xlu1 %v1119_v5  ;;  %1050 = vset.pattern.permute.xlu0 %v1119_v5 }
   0xb   :  { %54 = vperm.xlu1 %1051, %v16_v4   ;;  %50 = vperm.xlu0 %1050, %v15_v1   ;;  %p1078_p4 = pnand %p1077_p3, %p1071_p0 }
   0xf   :  { %58 = vperm.xlu1 %1051, %v17_v0   ;;  %62 = vperm.xlu0 %1050, %v18_v3  }
  0x13   :  { %1052 = vset.pattern.permute.xlu1 %v1120_v6  ;;  %1053 = vset.pattern.permute.xlu0 %v1120_v6 }
  0x14   :  { %79 = vperm.xlu1 %1052, %v15_v1   ;;  %83 = vperm.xlu0 %1053, %v16_v4  }
  0x18   :  { %87 = vperm.xlu1 %1052, %v17_v0  }
  0x1c   :  { %91 = vperm.xlu1 %1052, %v18_v3  }
  0x81   :  { %v33_v7 = vpop.permute.xlu1 %32  ;;  %v23_v8 = vpop.permute.xlu0 %22 }
  0x82   :  { %v44_v17 = vmul.f32 %v983_v16, %v23_v8  ;;  %v46_v32 = vmul.f32 %v983_v16, %v33_v7 }
  0x85   :  { %v38_v9 = vpop.permute.xlu1 %37  ;;  %v28_v10 = vpop.permute.xlu0 %27 }
  0x86   :  { %v45_v18 = vmul.f32 %v983_v16, %v28_v10  ;;  %v47_v45 = vmul.f32 %v983_v16, %v38_v9  ;;  %v1121_v9 = vmov 683565275  }
  0x8a   :  { %v55_v11 = vpop.permute.xlu1 %54  ;;  %v51_v12 = vpop.permute.xlu0 %50 }
  0x8b   :  { %v70_v19 = vmul.f32 %v984_v13, %v55_v11  ;;  %v69_v20 = vmul.f32 %v984_v13, %v51_v12 }
  0x8d   :  { %v74_v24 = vadd.f32 %v70_v19, %v45_v18  ;;  %v73_v25 = vadd.f32 %v69_v20, %v44_v17  ;;  %v1124_v17 = vmov 2102212464   ;;  %v1125_v19 = vmov 920167782  }
  0x8e   :  { %v59_v14 = vpop.permute.xlu1 %58  ;;  %v63_v15 = vpop.permute.xlu0 %62 }
  0x8f   :  { %v71_v28 = vmul.f32 %v984_v13, %v59_v14  ;;  %v72_v41 = vmul.f32 %v984_v13, %v63_v15  ;;  %v1122_v13 = vmov 2475754826   ;;  %v1123_v15 = vmov 2131351028  }
  0x91   :  { %v75_v37 = vadd.f32 %v71_v28, %v46_v32  ;;  %v76_v53 = vadd.f32 %v72_v41, %v47_v45 }
  0x93   :  { %v80_v22 = vpop.permute.xlu1 %79  ;;  %v84_v23 = vpop.permute.xlu0 %83 }
  0x94   :  { %v98_v26 = vmul.f32 %v985_v21, %v80_v22  ;;  %v99_v27 = vmul.f32 %v985_v21, %v84_v23 }
  0x96   :  { %v102_v30 = vadd.f32 %v98_v26, %v73_v25  ;;  %v103_v31 = vadd.f32 %v99_v27, %v74_v24  ;;  %v1126_v26 = vmov 1326507024  }
  0x97   :  { %v88_v33 = vpop.permute.xlu1 %87 }
  0x98   :  { %v1175_v34 = vsub.f32 %v102_v30, %v986_v29  ;;  %v1177_v35 = vsub.f32 %v103_v31, %v986_v29  ;;  %v100_v36 = vmul.f32 %v985_v21, %v88_v33 }
  0x9a   :  { %v115_v38 = vand.u32 2147483647, %v1175_v34  ;;  %v118_v39 = vand.u32 2139095040, %v1175_v34  ;;  %v218_v40 = vand.u32 2147483647, %v1177_v35  ;;  %v221_v42 = vand.u32 2139095040, %v1177_v35 }
  0x9b   :  { %v104_v43 = vadd.f32 %v100_v36, %v75_v37  ;;  %v92_v44 = vpop.permute.xlu1 %91  ;;  %vm117_vm12 = vcmp.lt.s32.totalorder %v1175_v34, 0 }
  0x9c   :  { %v119_v46 = vshrl.u32 %v118_v39, 23  ;;  %v122_v47 = vand.u32 8388607, %v115_v38  ;;  %v222_v48 = vshrl.u32 %v221_v42, 23  ;;  %v225_v49 = vand.u32 8388607, %v218_v40 }
  0x9d   :  { %v1187_v50 = vsub.f32 %v104_v43, %v986_v29  ;;  %v101_v51 = vmul.f32 %v985_v21, %v92_v44  ;;  %vm1282_vm14 = vcmp.le.f32.partialorder %v115_v38, 0.7853982 }
  0x9e   :  { %v987_v52 = vadd.s32 4294967169, %v119_v46  ;;  %v991_v54 = vadd.s32 4294967169, %v222_v48  ;;  %v123_v55 = vor.u32 8388608, %v122_v47  ;;  %v226_v58 = vor.u32 8388608, %v225_v49 }
  0x9f   :  { %v324_v57 = vand.u32 2139095040, %v1187_v50  ;;  %v321_v60 = vand.u32 2147483647, %v1187_v50  ;;  %v105_v61 = vadd.f32 %v101_v51, %v76_v53 }
  0xa0   :  { %v125_v56 = vadd.s32 1, %v987_v52  ;;  %v228_v59 = vadd.s32 1, %v991_v54  ;;  %v1191_v2 = vshll.u32 %v123_v55, 8  ;;  %v1193_v4 = vshll.u32 %v226_v58, 8 }
  0xa1   :  { %v325_v62 = vshrl.u32 %v324_v57, 23  ;;  %v1199_v6 = vand.u32 8388607, %v321_v60  ;;  %v1201_v7 = vsub.f32 %v105_v61, %v986_v29 }
  0xa2   :  { %vm126_vm0 = vcmp.gt.s32.totalorder %v125_v56, 0  ;;  %vm229_vm1 = vcmp.gt.s32.totalorder %v228_v59, 0 }
  0xa3   :  { %v127_v63 = vsel %vm126_vm0, %v125_v56, 0  ;;  %v230_v3 = vsel %vm229_vm1, %v228_v59, 0  ;;  %v1195_v5 = vadd.s32 4294967169, %v325_v62 }
  0xa4   :  { %v128_v0 = vshrl.u32 %v127_v63, 5  ;;  %v129_v1 = vand.u32 31, %v127_v63  ;;  %v1204_v11 = vshrl.u32 %v230_v3, 5  ;;  %v232_v12 = vand.u32 31, %v230_v3 }
  0xa6   :  { %v130_v8 = vsub.s32 32, %v129_v1  ;;  %v132_v10 = vshll.u32 %v1121_v9, %v129_v1  ;;  %v135_v14 = vshll.u32 %v1122_v13, %v129_v1  ;;  %v138_v16 = vshll.u32 %v1123_v15, %v129_v1 }
  0xa7   :  { %v141_v18 = vshll.u32 %v1124_v17, %v129_v1  ;;  %v144_v20 = vshll.u32 %v1125_v19, %v129_v1  ;;  %vm147_vm2 = vcmp.lt.s32.totalorder %v128_v0, 1  ;;  %vm148_vm3 = vcmp.lt.s32.totalorder %v128_v0, 2 }
  0xa8   :  { %v133_v21 = vshrl.u32 %v1122_v13, %v130_v8  ;;  %v136_v22 = vshrl.u32 %v1123_v15, %v130_v8  ;;  %v139_v23 = vshrl.u32 %v1124_v17, %v130_v8  ;;  %v131_v24 = vshrl.u32 %v1121_v9, %v130_v8 }
  0xa9   :  { %v142_v25 = vshrl.u32 %v1125_v19, %v130_v8  ;;  %v145_v27 = vshrl.u32 %v1126_v26, %v130_v8  ;;  %v233_v31 = vsub.s32 32, %v232_v12  ;;  %vm149_vm4 = vcmp.lt.s32.totalorder %v128_v0, 3 }
  0xaa   :  { %v134_v28 = vor.u32 %v133_v21, %v132_v10  ;;  %v137_v29 = vor.u32 %v136_v22, %v135_v14  ;;  %v140_v30 = vor.u32 %v139_v23, %v138_v16  ;;  %vm150_vm5 = vcmp.lt.s32.totalorder %v128_v0, 4 }
  0xab   :  { %v143_v32 = vor.u32 %v142_v25, %v141_v18  ;;  %v146_v33 = vor.u32 %v145_v27, %v144_v20  ;;  %v235_v45 = vshll.u32 %v1121_v9, %v232_v12  ;;  %v236_v48 = vshrl.u32 %v1122_v13, %v233_v31 }
  0xac   :  { %v151_v36 = vsel %vm147_vm2, %v131_v24, %v134_v28  ;;  %v152_v37 = vsel %vm150_vm5, %v140_v30, 2102212464  ;;  %v155_v39 = vsel %vm147_vm2, %v134_v28, %v137_v29  ;;  %v159_v41 = vsel %vm147_vm2, %v137_v29, %v140_v30 }
  0xad   :  { %v153_v42 = vsel %vm149_vm4, %v137_v29, %v152_v37  ;;  %v156_v43 = vsel %vm150_vm5, %v143_v32, 920167782  ;;  %v160_v44 = vsel %vm150_vm5, %v146_v33, 1326507024  ;;  %v238_v49 = vshll.u32 %v1122_v13, %v232_v12 }
  0xae   :  { %v157_v46 = vsel %vm149_vm4, %v140_v30, %v156_v43  ;;  %v161_v47 = vsel %vm149_vm4, %v143_v32, %v160_v44  ;;  %v154_v51 = vsel %vm148_vm3, %v151_v36, %v153_v42  ;;  %v239_v54 = vshrl.u32 %v1123_v15, %v233_v31 }
  0xaf   :  { %v158_v52 = vsel %vm148_vm3, %v155_v39, %v157_v46  ;;  %v162_v53 = vsel %vm148_vm3, %v159_v41, %v161_v47  ;;  %v237_v59 = vor.u32 %v236_v48, %v235_v45  ;;  %v241_v62 = vshll.u32 %v1123_v15, %v232_v12 }
  0xb0   :  { %v1227_v55 = vmul.u32.u64.low %v1191_v2, %v162_v53  ;;  %v1228_v56 = vmul.u32.u64.high %v1191_v2, %v162_v53, %v1227_v55  ;;  %v1231_v57 = vmul.u32.u64.low %v1191_v2, %v158_v52  ;;  %v1232_v58 = vmul.u32.u64.high %v1191_v2, %v158_v52, %v1231_v57 }
  0xb1   :  { %v240_v61 = vor.u32 %v239_v54, %v238_v49  ;;  %v242_v63 = vshrl.u32 %v1124_v17, %v233_v31  ;;  %v234_v1 = vshrl.u32 %v1121_v9, %v233_v31  ;;  %v244_v0 = vshll.u32 %v1124_v17, %v232_v12 }
  0xb2   :  { %v245_v3 = vshrl.u32 %v1125_v19, %v233_v31  ;;  %v248_v8 = vshrl.u32 %v1126_v26, %v233_v31  ;;  %v170_v10 = vmul.u32 %v1191_v2, %v154_v51  ;;  %v247_v16 = vshll.u32 %v1125_v19, %v232_v12 }
  0xb3   :  { %v243_v14 = vor.u32 %v242_v63, %v241_v62  ;;  %vm250_vm6 = vcmp.lt.s32.totalorder %v1204_v11, 1  ;;  %vm172_vm7 = vc.u32 %v1228_v56, %v1231_v57  ;;  %v173_v18 = vadd.s32 1, %v1232_v58 }
  0xb4   :  { %v246_v20 = vor.u32 %v245_v3, %v244_v0  ;;  %vm251_vm8 = vcmp.lt.s32.totalorder %v1204_v11, 2  ;;  %v249_v21 = vor.u32 %v248_v8, %v247_v16  ;;  %vm252_vm9 = vcmp.lt.s32.totalorder %v1204_v11, 3 }
  0xb5   :  { %vm253_vm10 = vcmp.lt.s32.totalorder %v1204_v11, 4  ;;  %v258_v22 = vsel %vm250_vm6, %v237_v59, %v240_v61  ;;  %v174_v2 = vsel %vm172_vm7, %v173_v18, %v1232_v58  ;;  %v262_v12 = vsel %vm250_vm6, %v240_v61, %v243_v14 }
  0xb6   :  { %v255_v23 = vsel %vm253_vm10, %v243_v14, 2102212464  ;;  %v259_v24 = vsel %vm253_vm10, %v246_v20, 920167782  ;;  %v175_v25 = vadd.s32 %v174_v2, %v170_v10  ;;  %v254_v27 = vsel %vm250_vm6, %v234_v1, %v237_v59 }
  0xb7   :  { %v260_v28 = vsel %vm252_vm9, %v243_v14, %v259_v24  ;;  %v263_v29 = vsel %vm253_vm10, %v249_v21, 1326507024  ;;  %v256_v30 = vsel %vm252_vm9, %v240_v61, %v255_v23  ;;  %v331_v33 = vadd.s32 1, %v1195_v5 }
  0xb8   :  { %v261_v31 = vsel %vm251_vm8, %v258_v22, %v260_v28  ;;  %v264_v32 = vsel %vm252_vm9, %v246_v20, %v263_v29  ;;  %v176_v36 = vadd.s32 536870912, %v175_v25  ;;  %v257_v45 = vsel %vm251_vm8, %v254_v27, %v256_v30 }
  0xb9   :  { %v265_v37 = vsel %vm251_vm8, %v262_v12, %v264_v32  ;;  %v1255_v39 = vmul.u32.u64.low %v1193_v4, %v261_v31  ;;  %v1256_v41 = vmul.u32.u64.high %v1193_v4, %v261_v31, %v1255_v39  ;;  %vm332_vm11 = vcmp.gt.s32.totalorder %v331_v33, 0 }
  0xba   :  { %v1260_v42 = vmul.u32.u64.low %v1193_v4, %v265_v37  ;;  %v1261_v43 = vmul.u32.u64.high %v1193_v4, %v265_v37, %v1260_v42  ;;  %v177_v44 = vshrl.u32 %v176_v36, 30  ;;  %v329_v5 = vor.u32 8388608, %v1199_v6 }
  0xbb   :  { %v333_v46 = vsel %vm332_vm11, %v331_v33, 0  ;;  %v427_v48 = vand.u32 2139095040, %v1201_v7  ;;  %v276_v51 = vadd.s32 1, %v1256_v41  ;;  %v273_v52 = vmul.u32 %v1193_v4, %v257_v45 }
  0xbc   :  { %v335_v47 = vand.u32 31, %v333_v46  ;;  %v178_v49 = vshll.u32 %v177_v44, 30  ;;  %vm275_vm13 = vc.u32 %v1261_v43, %v1255_v39  ;;  %v424_v11 = vand.u32 2147483647, %v1201_v7 }
  0xbd   :  { %v171_v54 = vadd.s32 %v1231_v57, %v1228_v56  ;;  %v277_v55 = vsel %vm275_vm13, %v276_v51, %v1256_v41  ;;  %v1277_v58 = vshll.u32 %v329_v5, 8  ;;  %v334_v61 = vshrl.u32 %v333_v46, 5 }
  0xbe   :  { %v336_v53 = vsub.s32 32, %v335_v47  ;;  %v1274_v6 = vsub.s32 %v175_v25, %v178_v49  ;;  %v278_v59 = vadd.s32 %v277_v55, %v273_v52  ;;  %v428_v63 = vshrl.u32 %v427_v48, 23 }
  0xbf   :  { %v201_v56 = vsub.s32 4, %v177_v44  ;;  %v338_v57 = vshll.u32 %v1121_v9, %v335_v47  ;;  %v341_v8 = vshll.u32 %v1122_v13, %v335_v47  ;;  %v344_v10 = vshll.u32 %v1123_v15, %v335_v47 }
  0xc0   :  { %v339_v62 = vshrl.u32 %v1122_v13, %v336_v53  ;;  %v181_v1 = vsub.s32 0, %v1274_v6  ;;  %v342_v0 = vshrl.u32 %v1123_v15, %v336_v53  ;;  %v279_v3 = vadd.s32 536870912, %v278_v59 }
  0xc1   :  { %v345_v14 = vshrl.u32 %v1124_v17, %v336_v53  ;;  %v347_v18 = vshll.u32 %v1124_v17, %v335_v47  ;;  %v348_v20 = vshrl.u32 %v1125_v19, %v336_v53  ;;  %v351_v23 = vshrl.u32 %v1126_v26, %v336_v53 }
  0xc2   :  { %v988_v16 = vmin.u32 %v181_v1, %v1274_v6  ;;  %v340_v38 = vor.u32 %v339_v62, %v338_v57  ;;  %v280_v21 = vshrl.u32 %v279_v3, 30  ;;  %v343_v22 = vor.u32 %v342_v0, %v341_v8 }
  0xc3   :  { %v346_v2 = vor.u32 %v345_v14, %v344_v10  ;;  %v349_v12 = vor.u32 %v348_v20, %v347_v18  ;;  %v350_v25 = vshll.u32 %v1125_v19, %v335_v47  ;;  %v999_v27 = vadd.s32 4294967169, %v428_v63 }
  0xc4   :  { %v183_v24 = vclz %v988_v16  ;;  %v202_v28 = vsel %vm117_vm12, %v201_v56, %v177_v44  ;;  %v281_v29 = vshll.u32 %v280_v21, 30  ;;  %v337_v30 = vshrl.u32 %v1121_v9, %v336_v53 }
  0xc5   :  { %vm353_vm15 = vcmp.lt.s32.totalorder %v334_v61, 1  ;;  %v352_v32 = vor.u32 %v351_v23, %v350_v25  ;;  %vm355_vm0 = vcmp.lt.s32.totalorder %v334_v61, 3  ;;  %vm356_vm1 = vcmp.lt.s32.totalorder %v334_v61, 4 }
  0xc6   :  { %v989_v31 = vadd.s32 4294967294, %v183_v24  ;;  %vm220_vm2 = vcmp.lt.s32.totalorder %v1177_v35, 0  ;;  %v1301_v33 = vsub.s32 %v278_v59, %v281_v29  ;;  %v358_v36 = vsel %vm356_vm1, %v346_v2, 2102212464 }
  0xc7   :  { %v361_v37 = vsel %vm353_vm15, %v340_v38, %v343_v22  ;;  %v362_v41 = vsel %vm356_vm1, %v349_v12, 920167782  ;;  %v357_v42 = vsel %vm353_vm15, %v337_v30, %v340_v38  ;;  %v359_v44 = vsel %vm355_vm0, %v343_v22, %v358_v36 }
  0xc8   :  { %vm990_vm3 = vcmp.lt.s32.totalorder %v989_v31, 0  ;;  %v363_v45 = vsel %vm355_vm0, %v346_v2, %v362_v41  ;;  %v204_v46 = vsel %vm1282_vm14, 0, %v202_v28  ;;  %v284_v47 = vsub.s32 0, %v1301_v33 }
  0xc9   :  { %v186_v5 = vsel %vm990_vm3, 0, %v989_v31  ;;  %vm354_vm4 = vcmp.lt.s32.totalorder %v334_v61, 2  ;;  %v304_v51 = vsub.s32 4, %v280_v21  ;;  %v365_v59 = vsel %vm353_vm15, %v343_v22, %v346_v2 }
  0xca   :  { %v187_v48 = vsub.s32 32, %v186_v5  ;;  %v191_v49 = vsub.s32 4294967266, %v186_v5  ;;  %v364_v52 = vsel %vm354_vm4, %v361_v37, %v363_v45  ;;  %v992_v53 = vmin.u32 %v284_v47, %v1301_v33 }
  0xcb   :  { %v360_v55 = vsel %vm354_vm4, %v357_v42, %v359_v44  ;;  %v366_v62 = vsel %vm356_vm1, %v352_v32, 1326507024  ;;  %v188_v63 = vshll.u32 %v1274_v6, %v186_v5  ;;  %vm1327_vm5 = vcmp.le.f32.partialorder %v218_v40, 0.7853982 }
  0xcc   :  { %v189_v1 = vshrl.u32 %v171_v54, %v187_v48  ;;  %v192_v56 = vadd.s32 127, %v191_v49  ;;  %v367_v57 = vsel %vm355_vm0, %v349_v12, %v366_v62  ;;  %v286_v0 = vclz %v992_v53 }
  0xcd   :  { %v368_v3 = vsel %vm354_vm4, %v365_v59, %v367_v57  ;;  %v1318_v8 = vmul.u32.u64.low %v1277_v58, %v364_v52  ;;  %v1319_v10 = vmul.u32.u64.high %v1277_v58, %v364_v52, %v1318_v8  ;;  %v431_v61 = vand.u32 8388607, %v424_v11 }
  0xce   :  { %v190_v14 = vor.u32 %v189_v1, %v188_v63  ;;  %v193_v16 = vshll.u32 %v192_v56, 23  ;;  %v1322_v38 = vmul.u32.u64.low %v1277_v58, %v368_v3  ;;  %v1323_v18 = vmul.u32.u64.high %v1277_v58, %v368_v3, %v1322_v38 }
  0xcf   :  { %v993_v54 = vadd.s32 4294967294, %v286_v0  ;;  %v434_v20 = vadd.s32 1, %v999_v27  ;;  %v624_v2 = vadd.s32 3, %v204_v46  ;;  %v274_v23 = vadd.s32 %v1255_v39, %v1261_v43 }
  0xd0   :  { %v194_v22 = vor.u32 4788187, %v193_v16  ;;  %v305_v24 = vsel %vm220_vm2, %v304_v51, %v280_v21  ;;  %v376_v12 = vmul.u32 %v1277_v58, %v360_v55  ;;  %v379_v40 = vadd.s32 1, %v1319_v10 }
  0xd1   :  { %vm994_vm6 = vcmp.lt.s32.totalorder %v993_v54, 0  ;;  %vm435_vm7 = vcmp.gt.s32.totalorder %v434_v20, 0  ;;  %v197_v28 = vcvt.s32.f32 %v190_v14  ;;  %vm378_vm8 = vc.u32 %v1323_v18, %v1318_v8 }
  0xd2   :  { %v195_v25 = vand.u32 2147483647, %v194_v22  ;;  %v289_v29 = vsel %vm994_vm6, 0, %v993_v54  ;;  %v307_v31 = vsel %vm1327_vm5, 0, %v305_v24  ;;  %v380_v39 = vsel %vm378_vm8, %v379_v40, %v1319_v10 }
  0xd3   :  { %v290_v27 = vsub.s32 32, %v289_v29  ;;  %v294_v30 = vsub.s32 4294967266, %v289_v29  ;;  %v381_v21 = vadd.s32 %v380_v39, %v376_v12  ;;  %v432_v32 = vor.u32 8388608, %v431_v61 }
  0xd4   :  { %v198_v43 = vmul.f32 %v197_v28, %v195_v25  ;;  %v436_v36 = vsel %vm435_vm7, %v434_v20, 0  ;;  %v291_v58 = vshll.u32 %v1301_v33, %v289_v29  ;;  %v1344_v45 = vand.u32 3, %v624_v2 }
  0xd5   :  { %v292_v37 = vshrl.u32 %v274_v23, %v290_v27  ;;  %v295_v41 = vadd.s32 127, %v294_v30  ;;  %v438_v42 = vand.u32 31, %v436_v36  ;;  %v382_v5 = vadd.s32 536870912, %v381_v21 }
  0xd6   :  { %v199_v44 = vxor.u32 2147483648, %v198_v43  ;;  %v1346_v49 = vadd.s32 3, %v307_v31  ;;  %v1352_v55 = vand.u32 3, %v204_v46  ;;  %v1354_v33 = vand.u32 3, %v307_v31 }
  0xd7   :  { %v293_v47 = vor.u32 %v292_v37, %v291_v58  ;;  %v296_v48 = vshll.u32 %v295_v41, 23  ;;  %v439_v51 = vsub.s32 32, %v438_v42  ;;  %v1350_v53 = vshrl.u32 %v382_v5, 30 }
  0xd8   :  { %v200_v52 = vsel %vm117_vm12, %v199_v44, %v198_v43  ;;  %v441_v63 = vshll.u32 %v1121_v9, %v438_v42  ;;  %v1360_v1 = vshll.u32 %v432_v32, 8  ;;  %v437_v4 = vshrl.u32 %v436_v36, 5 }
  0xd9   :  { %v203_v59 = vsel %vm1282_vm14, %v1175_v34, %v200_v52  ;;  %v297_v62 = vor.u32 4788187, %v296_v48  ;;  %v300_v56 = vcvt.s32.f32 %v293_v47  ;;  %v384_v57 = vshll.u32 %v1350_v53, 30 }
  0xda   :  { %1054 = vcosq.f32 %v203_v59  ;;  %v442_v0 = vshrl.u32 %v1122_v13, %v439_v51  ;;  %v445_v3 = vshrl.u32 %v1123_v15, %v439_v51  ;;  %v448_v10 = vshrl.u32 %v1124_v17, %v439_v51 }
  0xdb   :  { %1056 = vsinq.f32 %v203_v59  ;;  %v298_v46 = vand.u32 2147483647, %v297_v62  ;;  %v1366_v14 = vsub.s32 %v381_v21, %v384_v57  ;;  %v444_v16 = vshll.u32 %v1122_v13, %v438_v42 }
  0xdc   :  { %v447_v38 = vshll.u32 %v1123_v15, %v438_v42  ;;  %v377_v61 = vadd.s32 %v1318_v8, %v1323_v18  ;;  %v443_v20 = vor.u32 %v442_v0, %v441_v63  ;;  %v450_v22 = vshll.u32 %v1124_v17, %v438_v42 }
  0xdd   :  { %v301_v54 = vmul.f32 %v300_v56, %v298_v46  ;;  %v387_v2 = vsub.s32 0, %v1366_v14  ;;  %v446_v23 = vor.u32 %v445_v3, %v444_v16  ;;  %v451_v12 = vshrl.u32 %v1125_v19, %v439_v51 }
  0xde   :  { %v449_v24 = vor.u32 %v448_v10, %v447_v38  ;;  %v453_v25 = vshll.u32 %v1125_v19, %v438_v42  ;;  %v454_v28 = vshrl.u32 %v1126_v26, %v439_v51  ;;  %vm213_vm9 = vcmp.eq.s32.totalorder %v1352_v55, 2 }
  0xdf   :  { %v302_v40 = vxor.u32 2147483648, %v301_v54  ;;  %v996_v13 = vmin.u32 %v387_v2, %v1366_v14  ;;  %v440_v15 = vshrl.u32 %v1121_v9, %v439_v51  ;;  %v452_v8 = vor.u32 %v451_v12, %v450_v22 }
  0xe0   :  { %vm456_vm10 = vcmp.lt.s32.totalorder %v437_v4, 1  ;;  %v455_v18 = vor.u32 %v454_v28, %v453_v25  ;;  %vm457_vm11 = vcmp.lt.s32.totalorder %v437_v4, 2  ;;  %vm459_vm12 = vcmp.lt.s32.totalorder %v437_v4, 4 }
  0xe1   :  { %v303_v17 = vsel %vm220_vm2, %v302_v40, %v301_v54  ;;  %vm209_vm13 = vcmp.lt.s32.totalorder %v1352_v55, 2  ;;  %v389_v26 = vclz %v996_v13  ;;  %v461_v29 = vsel %vm459_vm12, %v449_v24, 2102212464 }
  0xe2   :  { %v306_v19 = vsel %vm1327_vm5, %v1177_v35, %v303_v17  ;;  %v464_v27 = vsel %vm456_vm10, %v443_v20, %v446_v23  ;;  %vm207_vm14 = vweird.f32 %v1175_v34  ;;  %vm458_vm15 = vcmp.lt.s32.totalorder %v437_v4, 3 }
  0xe3   :  { %1058 = vcosq.f32 %v306_v19  ;;  %v460_v9 = vsel %vm456_vm10, %v440_v15, %v443_v20  ;;  %v465_v30 = vsel %vm459_vm12, %v452_v8, 920167782  ;;  %v997_v39 = vadd.s32 4294967294, %v389_v26 }
  0xe4   :  { %v1055_v31 = vpop.eup %1054  ;;  %1060 = vsinq.f32 %v306_v19  ;;  %v466_v43 = vsel %vm458_vm15, %v449_v24, %v465_v30  ;;  %v468_v6 = vsel %vm456_vm10, %v446_v23, %v449_v24  ;;  %v462_v32 = vsel %vm458_vm15, %v446_v23, %v461_v29 }
  0xe5   :  { %v1057_v21 = vpop.eup %1056  ;;  %v467_v36 = vsel %vm457_vm11, %v464_v27, %v466_v43  ;;  %v469_v58 = vsel %vm459_vm12, %v455_v18, 1326507024  ;;  %v214_v37 = vxor.u32 2147483648, %v1055_v31  ;;  %vm998_vm0 = vcmp.lt.s32.totalorder %v997_v39, 0 }
  0xe6   :  { %v470_v41 = vsel %vm458_vm15, %v452_v8, %v469_v58  ;;  %v1394_v42 = vmul.u32.u64.low %v1360_v1, %v467_v36  ;;  %v1395_v44 = vmul.u32.u64.high %v1360_v1, %v467_v36, %v1394_v42  ;;  %v392_v5 = vsel %vm998_vm0, 0, %v997_v39 }
  0xe7   :  { %v471_v47 = vsel %vm457_vm11, %v468_v6, %v470_v41  ;;  %v211_v48 = vxor.u32 2147483648, %v1057_v21  ;;  %v215_v51 = vsel %vm213_vm9, %v214_v37, %v1057_v21  ;;  %v393_v52 = vsub.s32 32, %v392_v5 }
  0xe8   :  { %v397_v59 = vsub.s32 4294967266, %v392_v5  ;;  %v463_v62 = vsel %vm457_vm11, %v460_v9, %v462_v32  ;;  %vm210_vm1 = vcmp.eq.s32.totalorder %v1352_v55, 0  ;;  %v394_v63 = vshll.u32 %v1366_v14, %v392_v5 }
  0xe9   :  { %v1405_v56 = vmul.u32.u64.low %v1360_v1, %v471_v47  ;;  %v1406_v57 = vmul.u32.u64.high %v1360_v1, %v471_v47, %v1405_v56  ;;  %v212_v0 = vsel %vm210_vm1, %v1055_v31, %v211_v48  ;;  %v395_v46 = vshrl.u32 %v377_v61, %v393_v52 }
  0xea   :  { %v398_v3 = vadd.s32 127, %v397_v59  ;;  %v482_v10 = vadd.s32 1, %v1395_v44  ;;  %v216_v16 = vsel %vm209_vm13, %v212_v0, %v215_v51  ;;  %vm310_vm2 = vweird.f32 %v1177_v35 }
  0xeb   :  { %v729_v4 = vand.u32 3, %v1346_v49  ;;  %v407_v38 = vsub.s32 4, %v1350_v53  ;;  %v217_v14 = vsel %vm207_vm14, nan, %v216_v16  ;;  %vm626_vm3 = vcmp.lt.s32.totalorder %v1344_v45, 2 }
  0xec   :  { %v396_v54 = vor.u32 %v395_v46, %v394_v63  ;;  %v399_v20 = vshll.u32 %v398_v3, 23  ;;  %v479_v61 = vmul.u32 %v1360_v1, %v463_v62  ;;  %527 = vst [vmem:[#allocation2] sm:$0xff] %v217_v14  ;;  %vm627_vm4 = vcmp.eq.s32.totalorder %v1344_v45, 0 }
  0xed   :  { %v1059_v55 = vpop.eup %1058  ;;  %vm481_vm5 = vc.u32 %v1406_v57, %v1394_v42  ;;  %vm312_vm6 = vcmp.lt.s32.totalorder %v1354_v33, 2  ;;  %vm313_vm7 = vcmp.eq.s32.totalorder %v1354_v33, 0  ;;  %v629_v49 = vsel %vm627_vm4, %v1055_v31, %v211_v48 }
  0xee   :  { %v1061_v22 = vpop.eup %1060  ;;  %v400_v2 = vor.u32 4788187, %v399_v20  ;;  %v483_v23 = vsel %vm481_vm5, %v482_v10, %v1395_v44  ;;  %v317_v24 = vxor.u32 2147483648, %v1059_v55  ;;  %vm630_vm8 = vcmp.eq.s32.totalorder %v1344_v45, 2 }
  0xef   :  { %v484_v1 = vadd.s32 %v483_v23, %v479_v61  ;;  %v314_v12 = vxor.u32 2147483648, %v1061_v22  ;;  %vm316_vm9 = vcmp.eq.s32.totalorder %v1354_v33, 2  ;;  %v632_v40 = vsel %vm630_vm8, %v214_v37, %v1057_v21 }
  0xf0   :  { %v401_v25 = vand.u32 2147483647, %v400_v2  ;;  %v403_v28 = vcvt.s32.f32 %v396_v54  ;;  %v318_v13 = vsel %vm316_vm9, %v317_v24, %v1061_v22  ;;  %v633_v15 = vsel %vm626_vm3, %v629_v49, %v632_v40 }
  0xf1   :  { %v485_v8 = vadd.s32 536870912, %v484_v1  ;;  %v315_v17 = vsel %vm313_vm7, %v1059_v55, %v314_v12  ;;  %v634_v18 = vsel %vm207_vm14, nan, %v633_v15  ;;  %vm731_vm10 = vcmp.eq.s32.totalorder %v729_v4, 0 }
  0xf2   :  { %v404_v19 = vmul.f32 %v403_v28, %v401_v25  ;;  %v319_v26 = vsel %vm312_vm6, %v315_v17, %v318_v13  ;;  %v733_v29 = vsel %vm731_vm10, %v1059_v55, %v314_v12  ;;  %vm734_vm11 = vcmp.eq.s32.totalorder %v729_v4, 2  ;;  %947 = vst [vmem:[#allocation4] sm:$0xff] %v634_v18 }
  0xf3   :  { %v1434_v27 = vshrl.u32 %v485_v8, 30  ;;  %v320_v45 = vsel %vm310_vm2, nan, %v319_v26  ;;  %vm730_vm12 = vcmp.lt.s32.totalorder %v729_v4, 2  ;;  %v736_v9 = vsel %vm734_vm11, %v317_v24, %v1061_v22 }
  0xf4   :  { %v405_v30 = vxor.u32 2147483648, %v404_v19  ;;  %528 = vst [vmem:[#allocation2 + $0x8] sm:$0xff] %v320_v45  ;;  %v737_v31 = vsel %vm730_vm12, %v733_v29, %v736_v9  ;;  %vm323_vm13 = vcmp.lt.s32.totalorder %v1187_v50, 0  ;;  %vm322_vm14 = vcmp.le.f32.partialorder %v321_v60, 0.7853982 }
  0xf5   :  { %v487_v34 = vshll.u32 %v1434_v27, 30  ;;  %v738_v33 = vsel %vm310_vm2, nan, %v737_v31  ;;  %v408_v43 = vsel %vm323_vm13, %v407_v38, %v1350_v53  ;;  %v480_v60 = vadd.s32 %v1394_v42, %v1406_v57 }
  0xf6   :  { %v406_v39 = vsel %vm323_vm13, %v405_v30, %v404_v19  ;;  %948 = vst [vmem:[#allocation4 + $0x8] sm:$0xff] %v738_v33  ;;  %v410_v32 = vsel %vm322_vm14, 0, %v408_v43  ;;  %vm413_vm0 = vweird.f32 %v1187_v50  ;;  %v510_v22 = vsub.s32 4, %v1434_v27 }
  0xf7   :  { %v409_v6 = vsel %vm322_vm14, %v1187_v50, %v406_v39  ;;  %v488_v21 = vsub.s32 %v484_v1, %v487_v34  ;;  %v832_v37 = vadd.s32 3, %v410_v32  ;;  %v414_v44 = vand.u32 3, %v410_v32 }
  0xf8   :  { %1062 = vcosq.f32 %v409_v6  ;;  %vm426_vm7 = vcmp.lt.s32.totalorder %v1201_v7, 0  ;;  %vm425_vm8 = vcmp.le.f32.partialorder %v424_v11, 0.7853982 }
  0xf9   :  { %1064 = vsinq.f32 %v409_v6  ;;  %v490_v36 = vsub.s32 0, %v488_v21  ;;  %v833_v5 = vand.u32 3, %v832_v37  ;;  %vm416_vm1 = vcmp.eq.s32.totalorder %v414_v44, 0 }
  0xfa   :  { %vm419_vm2 = vcmp.eq.s32.totalorder %v414_v44, 2  ;;  %vm415_vm5 = vcmp.lt.s32.totalorder %v414_v44, 2  ;;  %v511_v24 = vsel %vm426_vm7, %v510_v22, %v1434_v27 }
  0xfb   :  { %v1000_v58 = vmin.u32 %v490_v36, %v488_v21  ;;  %vm835_vm3 = vcmp.eq.s32.totalorder %v833_v5, 0  ;;  %vm838_vm4 = vcmp.eq.s32.totalorder %v833_v5, 2  ;;  %vm834_vm6 = vcmp.lt.s32.totalorder %v833_v5, 2 }
  0xfc   :  { %v513_v1 = vsel %vm425_vm8, 0, %v511_v24 }
  0xfd   :  { %v492_v41 = vclz %v1000_v58  ;;  %v936_v12 = vadd.s32 3, %v513_v1  ;;  %v517_v25 = vand.u32 3, %v513_v1 }
  0xff   :  { %v1001_v35 = vadd.s32 4294967294, %v492_v41  ;;  %v937_v40 = vand.u32 3, %v936_v12  ;;  %vm522_vm9 = vcmp.eq.s32.totalorder %v517_v25, 2  ;;  %vm519_vm11 = vcmp.eq.s32.totalorder %v517_v25, 0 }
 0x100   :  { %vm518_vm13 = vcmp.lt.s32.totalorder %v517_v25, 2 }
 0x101   :  { %vm1002_vm15 = vcmp.lt.s32.totalorder %v1001_v35, 0  ;;  %vm942_vm10 = vcmp.eq.s32.totalorder %v937_v40, 2  ;;  %vm939_vm12 = vcmp.eq.s32.totalorder %v937_v40, 0  ;;  %vm938_vm14 = vcmp.lt.s32.totalorder %v937_v40, 2 }
 0x102   :  { %v1063_v47 = vpop.eup %1062  ;;  %v495_v53 = vsel %vm1002_vm15, 0, %v1001_v35  ;;  %vm516_vm15 = vweird.f32 %v1201_v7 }
 0x103   :  { %v1065_v48 = vpop.eup %1064  ;;  %v496_v51 = vsub.s32 32, %v495_v53  ;;  %v500_v52 = vsub.s32 4294967266, %v495_v53  ;;  %v420_v59 = vxor.u32 2147483648, %v1063_v47  ;;  %v497_v62 = vshll.u32 %v488_v21, %v495_v53 }
 0x104   :  { %v417_v63 = vxor.u32 2147483648, %v1065_v48 }
 0x105   :  { %v498_v56 = vshrl.u32 %v480_v60, %v496_v51  ;;  %v501_v0 = vadd.s32 127, %v500_v52  ;;  %v421_v46 = vsel %vm419_vm2, %v420_v59, %v1065_v48  ;;  %v840_v3 = vsel %vm838_vm4, %v420_v59, %v1065_v48 }
 0x106   :  { %v418_v10 = vsel %vm416_vm1, %v1063_v47, %v417_v63  ;;  %v837_v42 = vsel %vm835_vm3, %v1063_v47, %v417_v63 }
 0x107   :  { %v499_v57 = vor.u32 %v498_v56, %v497_v62  ;;  %v502_v16 = vshll.u32 %v501_v0, 23  ;;  %v422_v4 = vsel %vm415_vm5, %v418_v10, %v421_v46  ;;  %v841_v38 = vsel %vm834_vm6, %v837_v42, %v840_v3 }
 0x108   :  { %v423_v14 = vsel %vm413_vm0, nan, %v422_v4  ;;  %v842_v54 = vsel %vm413_vm0, nan, %v841_v38 }
 0x109   :  { %v503_v20 = vor.u32 4788187, %v502_v16  ;;  %529 = vst [vmem:[#allocation2 + $0x10] sm:$0xff] %v423_v14  ;;  %949 = vst [vmem:[#allocation4 + $0x10] sm:$0xff] %v842_v54  ;;  %v506_v55 = vcvt.s32.f32 %v499_v57 }
 0x10b   :  { %v504_v61 = vand.u32 2147483647, %v503_v20 }
 0x10d   :  { %v507_v49 = vmul.f32 %v506_v55, %v504_v61 }
 0x10f   :  { %v508_v2 = vxor.u32 2147483648, %v507_v49 }
 0x111   :  { %v509_v23 = vsel %vm426_vm7, %v508_v2, %v507_v49 }
 0x112   :  { %v512_v50 = vsel %vm425_vm8, %v1201_v7, %v509_v23 }
 0x113   :  { %1066 = vcosq.f32 %v512_v50 }
 0x114   :  { %1068 = vsinq.f32 %v512_v50 }
 0x11d   :  { %v1067_v28 = vpop.eup %1066 }
 0x11e   :  { %v1069_v13 = vpop.eup %1068  ;;  %v523_v15 = vxor.u32 2147483648, %v1067_v28 }
 0x11f   :  { %v520_v8 = vxor.u32 2147483648, %v1069_v13 }
 0x120   :  { %v524_v11 = vsel %vm522_vm9, %v523_v15, %v1069_v13  ;;  %v944_v17 = vsel %vm942_vm10, %v523_v15, %v1069_v13 }
 0x121   :  { %v521_v18 = vsel %vm519_vm11, %v1067_v28, %v520_v8  ;;  %v941_v19 = vsel %vm939_vm12, %v1067_v28, %v520_v8 }
 0x122   :  { %v525_v26 = vsel %vm518_vm13, %v521_v18, %v524_v11  ;;  %v945_v29 = vsel %vm938_vm14, %v941_v19, %v944_v17 }
 0x123   :  { %v526_v27 = vsel %vm516_vm15, nan, %v525_v26  ;;  %v946_v45 = vsel %vm516_vm15, nan, %v945_v29 }
 0x124   :  { %530 = vst [vmem:[#allocation2 + $0x18] sm:$0xff] %v526_v27  ;;  %950 = vst [vmem:[#allocation4 + $0x18] sm:$0xff] %v946_v45 }
 0x125   :  { %1081 = shalt.err (!%p1078_p4)
}
 0x126   :  { %s1082_s6 = scalar_lea.hbm %s1493_s2, 512 }
 0x127   :  { %p1083_p5 = scmp.ne.s32.totalorder %s1493_s2, %s1082_s6  ;;  %p1086_p6 = scmp.lt.u32.totalorder %s1082_s6, %s1493_s2 }
 0x129   :  { %p1088_p7 = pnand %p1086_p6, %p1083_p5 }
 0x12b   :  { %1091 = shalt.err (!%p1088_p7)
}
 0x12c   :  { %s1129_s11 = smov 128   ;;  %s1130_s12 = smov 8  }
 0x12d   :  { %962 = dma.vmem_to_hbm [thread:$0]  %s957_s27, 512, %s1493_s2, [#allocation3], %s1129_s11, %s1129_s11, %s1130_s12  }
 0x12e   :  { %s1092_s15 = scalar_lea.vmem %s1460_s29, 512  ;;  %p1097_p9 = scmp.lt.s32.totalorder %s1460_s29, %s1460_s29 }
 0x12f   :  { %p1093_p8 = scmp.ne.s32.totalorder %s1460_s29, %s1092_s15  ;;  %p1098_p10 = scmp.lt.s32.totalorder %s1092_s15, %s1092_s15 }
 0x131   :  { %p1099_p11 = por %p1098_p10, %p1097_p9 }
 0x133   :  { %p1100_p12 = pnand %p1099_p11, %p1093_p8 }
 0x135   :  { %1103 = shalt.err (!%p1100_p12)
}
 0x136   :  { %s1104_s18 = scalar_lea.hbm %s1494_s3, 512 }
 0x137   :  { %p1105_p13 = scmp.ne.s32.totalorder %s1494_s3, %s1104_s18  ;;  %p1108_p0 = scmp.lt.u32.totalorder %s1104_s18, %s1494_s3 }
 0x139   :  { %p1110_p1 = pnand %p1108_p0, %p1105_p13 }
 0x13b   :  { %1113 = shalt.err (!%p1110_p1)
}
 0x13c   :  { %974 = dma.vmem_to_hbm [thread:$0]  %s1460_s29, 512, %s1494_s3, [#allocation5], %s1129_s11, %s1129_s11, %s1130_s12  }
 0x13d   :  { %1114 = dma.done.wait [#allocation3], 512  }
 0x13e   :  { %1115 = vsyncadd [#allocation3], 4294966784 }
 0x13f   :  { %1116 = dma.done.wait [#allocation5], 512  }
 0x140   :  { %1117 = vsyncadd [#allocation5], 4294966784 }
 0x141   :  { %981 = vsyncpa [#allocation3], 1 }
 0x142   :  { %982 = vsyncpa [#allocation5], 1 }

</bundles_post_ra>
